<compile_context>
chip_gen: v5e
topology: v5e:2x2
jax: 0.10.0
libtpu: 0.0.40
codegen_flags: <defaults>
</compile_context>

<pallas_src>
import functools
import numpy as np
import jax
import jax.numpy as jnp
from jax.experimental import pallas as pl
from jax.experimental.pallas import tpu as pltpu


def _pick_tile(n, target, align):
    """Tile size for an axis of length n: n itself if small enough, otherwise
    the largest divisor of n that is a multiple of `align` and <= target
    (falls back to n, i.e. a full-extent block, which is always legal)."""
    if n <= target:
        return n
    t = (target // align) * align
    while t >= align:
        if n % t == 0:
            return t
        t -= align
    return n


# ----------------------------------------------------------------------------
# Kernel 1: 1x1 conv + folded BatchNorm (+ReLU), pixels on the lane axis.
# ----------------------------------------------------------------------------

def _side_conv_kernel(x_ref, w_ref, scale_ref, bias_ref, o_ref, *, relu):
    # x_ref: (1, Cin, TM)  ; w_ref: (Cout, Cin) ; scale/bias: (Cout, 1)
    y = jnp.dot(w_ref[...], x_ref[0], preferred_element_type=jnp.float32)
    y = y * scale_ref[...] + bias_ref[...]
    if relu:
        y = jnp.maximum(y, 0.0)
    o_ref[0] = y.astype(o_ref.dtype)


def side_conv(x_ncp, w, scale, bias, relu):
    """x_ncp: (N, Cin, P) with pixels last; w: (Cout, Cin) -> (N, Cout, P)."""
    N, Cin, P = x_ncp.shape
    Cout = w.shape[0]
    TM = _pick_tile(P, 2048, 128)            # lane-dense pixel tile
    kernel = functools.partial(_side_conv_kernel, relu=relu)
    return pl.pallas_call(
        kernel,
        out_shape=jax.ShapeDtypeStruct((N, Cout, P), jnp.float32),
        grid=(N, pl.cdiv(P, TM)),
        in_specs=[
            pl.BlockSpec((1, Cin, TM), lambda n, t: (n, 0, t)),
            pl.BlockSpec((Cout, Cin), lambda n, t: (0, 0)),   # stays resident
            pl.BlockSpec((Cout, 1), lambda n, t: (0, 0)),
            pl.BlockSpec((Cout, 1), lambda n, t: (0, 0)),
        ],
        out_specs=pl.BlockSpec((1, Cout, TM), lambda n, t: (n, 0, t)),
        compiler_params=pltpu.CompilerParams(
            dimension_semantics=("parallel", "parallel"),
            vmem_limit_bytes=32 * 1024 * 1024),
    )(x_ncp, w, scale.reshape(Cout, 1), bias.reshape(Cout, 1))


# ----------------------------------------------------------------------------
# Kernel 2: fused bilinear upsample (all 4 side maps) + interleave-concat +
#           grouped 1x1 pred conv.  Writes only the final full-res output.
# ----------------------------------------------------------------------------

def _bilinear_matrix(in_size, out_size):
    """PyTorch F.interpolate(mode='bilinear', align_corners=False) weights."""
    m = np.zeros((out_size, in_size), dtype=np.float32)
    scale = in_size / out_size
    for i in range(out_size):
        s = max((i + 0.5) * scale - 0.5, 0.0)
        x0 = int(np.floor(s))
        x1 = min(x0 + 1, in_size - 1)
        lam = s - x0
        m[i, x0] += 1.0 - lam
        m[i, x1] += lam
    return m


def _upsample_pred_kernel(s5_ref, s1_ref, s2_ref, s3_ref,
                          wh1_ref, ww1t_ref, wh2_ref, ww2t_ref,
                          wh3_ref, ww3t_ref, wp_ref, bp_ref, o_ref,
                          *, num_classes, compute_dtype):
    cd = compute_dtype

    def up(wh, x, wwt):                      # separable resize: Wh @ X @ Ww^T
        t = jnp.dot(wh.astype(cd), x.astype(cd),
                    preferred_element_type=jnp.float32)        # (TH, w_low)
        return jnp.dot(t.astype(cd), wwt.astype(cd),
                       preferred_element_type=jnp.float32)     # (TH, W)

    u1 = up(wh1_ref[...], s1_ref[0], ww1t_ref[...])
    u2 = up(wh2_ref[...], s2_ref[0], ww2t_ref[...])
    u3 = up(wh3_ref[...], s3_ref[0], ww3t_ref[...])

    # Group k of the interleaved concat is [s5_k, s1, s2, s3], so
    #   out[k] = wp[k,0]*up(s5_k) + wp[k,1]*u1 + wp[k,2]*u2 + wp[k,3]*u3 + bp[k]
    for k in range(num_classes):                               # static unroll
        u5k = up(wh3_ref[...], s5_ref[0, k], ww3t_ref[...])    # shares Wh3/Ww3
        o_ref[0, k] = (wp_ref[k, 0] * u5k
                       + wp_ref[k, 1] * u1
                       + wp_ref[k, 2] * u2
                       + wp_ref[k, 3] * u3
                       + bp_ref[k]).astype(o_ref.dtype)


def upsample_pred(s5, s1, s2, s3, wp, bp, out_hw, compute_dtype=jnp.float32):
    """s5: (N,K,h3,w3), s1/s2/s3: (N,h_i,w_i) -> (N,K,H,W) final prediction."""
    N, K, h3, w3 = s5.shape
    _, h1, w1 = s1.shape
    _, h2, w2 = s2.shape
    H, W = out_hw

    wh1 = jnp.asarray(_bilinear_matrix(h1, H))
    ww1t = jnp.asarray(_bilinear_matrix(w1, W).T)
    wh2 = jnp.asarray(_bilinear_matrix(h2, H))
    ww2t = jnp.asarray(_bilinear_matrix(w2, W).T)
    wh3 = jnp.asarray(_bilinear_matrix(h3, H))     # shared by s3 and s5
    ww3t = jnp.asarray(_bilinear_matrix(w3, W).T)

    TH = _pick_tile(H, 128, 8)                     # output row tile
    kernel = functools.partial(_upsample_pred_kernel,
                               num_classes=K, compute_dtype=compute_dtype)
    return pl.pallas_call(
        kernel,
        out_shape=jax.ShapeDtypeStruct((N, K, H, W), jnp.float32),
        grid=(N, pl.cdiv(H, TH)),
        in_specs=[
            pl.BlockSpec((1, K, h3, w3), lambda n, t: (n, 0, 0, 0)),
            pl.BlockSpec((1, h1, w1), lambda n, t: (n, 0, 0)),
            pl.BlockSpec((1, h2, w2), lambda n, t: (n, 0, 0)),
            pl.BlockSpec((1, h3, w3), lambda n, t: (n, 0, 0)),
            pl.BlockSpec((TH, h1), lambda n, t: (t, 0)),
            pl.BlockSpec((w1, W), lambda n, t: (0, 0)),
            pl.BlockSpec((TH, h2), lambda n, t: (t, 0)),
            pl.BlockSpec((w2, W), lambda n, t: (0, 0)),
            pl.BlockSpec((TH, h3), lambda n, t: (t, 0)),
            pl.BlockSpec((w3, W), lambda n, t: (0, 0)),
            pl.BlockSpec(memory_space=pltpu.MemorySpace.SMEM),   # wp (K, 4)
            pl.BlockSpec(memory_space=pltpu.MemorySpace.SMEM),   # bp (K,)
        ],
        out_specs=pl.BlockSpec((1, K, TH, W), lambda n, t: (n, 0, t, 0)),
        compiler_params=pltpu.CompilerParams(
            dimension_semantics=("parallel", "parallel"),
            vmem_limit_bytes=32 * 1024 * 1024),
    )(s5, s1, s2, s3, wh1, ww1t, wh2, ww2t, wh3, ww3t, wp, bp)


# ----------------------------------------------------------------------------
# Glue: synthetic backbone, parameter init, full forward, pure-JAX reference.
# ----------------------------------------------------------------------------

def _avg_pool_nchw(x, k):
    N, C, H, W = x.shape
    return x.reshape(N, C, H // k, k, W // k, k).mean(axis=(3, 5))


def synthetic_backbone(x_nchw, p):
    """Deterministic stand-in for the external backbone (avg-pool + 1x1 proj)."""
    hp = jax.lax.Precision.HIGHEST
    c1 = jnp.einsum('nchw,cd->ndhw', _avg_pool_nchw(x_nchw, 2), p['proj1'], precision=hp)
    c2 = jnp.einsum('nchw,cd->ndhw', _avg_pool_nchw(x_nchw, 4), p['proj2'], precision=hp)
    c3 = jnp.einsum('nchw,cd->ndhw', _avg_pool_nchw(x_nchw, 8), p['proj3'], precision=hp)
    c5 = jnp.einsum('nchw,cd->ndhw', _avg_pool_nchw(x_nchw, 8), p['proj5'], precision=hp)
    return c1, c2, c3, c5


def init_params(key, img_channels, side_in_channels, num_classes):
    ks = jax.random.split(key, 32)
    ki = iter(ks)
    p = {}
    # synthetic backbone projections (backbone is external to CASENet)
    p['proj1'] = 0.2 * jax.random.normal(next(ki), (img_channels, side_in_channels[0]), jnp.float32)
    p['proj2'] = 0.2 * jax.random.normal(next(ki), (img_channels, side_in_channels[1]), jnp.float32)
    p['proj3'] = 0.2 * jax.random.normal(next(ki), (img_channels, side_in_channels[2]), jnp.float32)
    p['proj5'] = 0.2 * jax.random.normal(next(ki), (img_channels, side_in_channels[3]), jnp.float32)

    # side1/2/3: Conv2d(C, 1, 1) + BatchNorm2d(1) + ReLU (conv bias folded in BN)
    for name, cin in zip(('1', '2', '3'), side_in_channels[:3]):
        w = 0.1 * jax.random.normal(next(ki), (1, cin), jnp.float32)     # (Cout, Cin)
        gamma = 1.0 + 0.1 * jax.random.normal(next(ki), (1,), jnp.float32)
        beta = 0.1 * jax.random.normal(next(ki), (1,), jnp.float32)
        mean = 0.1 * jax.random.normal(next(ki), (1,), jnp.float32)
        var = 0.5 + jax.random.uniform(next(ki), (1,), jnp.float32)
        scale = gamma / jnp.sqrt(var + 1e-5)          # eval-mode BN folding
        bias = beta - mean * scale
        p['w' + name], p['scale' + name], p['bias' + name] = w, scale, bias

    # side5: plain Conv2d(C5, num_classes, 1) with bias, no norm/activation
    p['w5'] = 0.1 * jax.random.normal(next(ki), (num_classes, side_in_channels[3]), jnp.float32)
    p['b5'] = 0.1 * jax.random.normal(next(ki), (num_classes,), jnp.float32)
    p['scale5'] = jnp.ones((num_classes,), jnp.float32)

    # pred: Conv2d(4*K, K, 1, groups=K) -> weight (K, 4), bias (K,)
    p['wp'] = 0.1 * jax.random.normal(next(ki), (num_classes, 4), jnp.float32)
    p['bp'] = 0.1 * jax.random.normal(next(ki), (num_classes,), jnp.float32)
    return p


def casenet_forward(x_nchw, p, num_classes, compute_dtype=jnp.float32):
    # compute_dtype=jnp.bfloat16 is recommended on v6e/v7x for the upsample
    # matmuls (f32 accumulation kept); f32 default preserves exact parity.
    N, _, H, W = x_nchw.shape
    x = x_nchw.astype(jnp.float32)
    c1, c2, c3, c5 = synthetic_backbone(x, p)

    # nn.Dropout2d(dropout=0) is the identity at p=0 / eval mode.
    # TODO(synk): Dropout2d not implemented for p > 0 (module is used with dropout=0 here).

    def flat(c):
        n, ch, h, w = c.shape
        return c.reshape(n, ch, h * w), (h, w)

    c1f, (h1, w1) = flat(c1)
    c2f, (h2, w2) = flat(c2)
    c3f, (h3, w3) = flat(c3)
    c5f, _ = flat(c5)

    s1 = side_conv(c1f, p['w1'], p['scale1'], p['bias1'], relu=True).reshape(N, h1, w1)
    s2 = side_conv(c2f, p['w2'], p['scale2'], p['bias2'], relu=True).reshape(N, h2, w2)
    s3 = side_conv(c3f, p['w3'], p['scale3'], p['bias3'], relu=True).reshape(N, h3, w3)
    s5 = side_conv(c5f, p['w5'], p['scale5'], p['b5'], relu=False).reshape(N, num_classes, h3, w3)

    return upsample_pred(s5, s1, s2, s3, p['wp'], p['bp'], (H, W),
                         compute_dtype=compute_dtype)


def reference_forward(x_nchw, p, num_classes):
    """Pure-JAX reference (same math, no Pallas) for a correctness check."""
    hp = jax.lax.Precision.HIGHEST
    N, _, H, W = x_nchw.shape
    c1, c2, c3, c5 = synthetic_backbone(x_nchw.astype(jnp.float32), p)

    def side(c, w, scale, bias, relu):
        y = jnp.einsum('oc,nchw->nohw', w, c, precision=hp)
        y = y * scale[None, :, None, None] + bias[None, :, None, None]
        return jnp.maximum(y, 0.0) if relu else y

    s1 = side(c1, p['w1'], p['scale1'], p['bias1'], True)
    s2 = side(c2, p['w2'], p['scale2'], p['bias2'], True)
    s3 = side(c3, p['w3'], p['scale3'], p['bias3'], True)
    s5 = side(c5, p['w5'], p['scale5'], p['b5'], False)

    def up(s):
        _, _, h, w = s.shape
        wh = jnp.asarray(_bilinear_matrix(h, H))
        wwt = jnp.asarray(_bilinear_matrix(w, W).T)
        return jnp.einsum('Hh,nchw,wW->ncHW', wh, s, wwt, precision=hp)

    u1, u2, u3, u5 = up(s1), up(s2), up(s3), up(s5)
    wp, bp = p['wp'], p['bp']
    return (wp[None, :, 0, None, None] * u5
            + wp[None, :, 1, None, None] * u1
            + wp[None, :, 2, None, None] * u2
            + wp[None, :, 3, None, None] * u3
            + bp[None, :, None, None])


# ----------------------------------------------------------------------------

if __name__ == "__main__":
    key = jax.random.PRNGKey(0)
    k_in, k_par = jax.random.split(key)

    N, Cimg, H, W = 2, 3, 16, 16
    num_classes = 4
    side_in_channels = (16, 24, 32, 64)

    x = jax.random.normal(k_in, (N, Cimg, H, W), jnp.float32)
    params = init_params(k_par, Cimg, side_in_channels, num_classes)

    out = jax.block_until_ready(casenet_forward(x, params, num_classes))
    ref = jax.block_until_ready(reference_forward(x, params, num_classes))

    assert out.shape == (N, num_classes, H, W), out.shape
    assert out.dtype == jnp.float32
    assert bool(jnp.all(jnp.isfinite(out)))
    np.testing.assert_allclose(np.asarray(out), np.asarray(ref), rtol=2e-2, atol=2e-2)
    print("KERNEL_OK")
</pallas_src>

<mosaic_0001>
module attributes {stable_mosaic.version = 11 : i64} {
  func.func @_side_conv_kernel(%arg0: i32, %arg1: i32, %arg2: memref<1x16x64xf32, #tpu.memory_space<vmem>>, %arg3: memref<1x16xf32, #tpu.memory_space<vmem>>, %arg4: memref<1x1xf32, #tpu.memory_space<vmem>>, %arg5: memref<1x1xf32, #tpu.memory_space<vmem>>, %arg6: memref<1x1x64xf32, #tpu.memory_space<vmem>>) attributes {dimension_semantics = [#tpu.dimension_semantics<parallel>, #tpu.dimension_semantics<parallel>], iteration_bounds = array<i64: 2, 1>, scalar_prefetch = 0 : i64, scratch_operands = 0 : i64, tpu.core_type = #tpu.core_type<tc>, window_params = [{transform_indices = @transform_0, window_bounds = array<i64: 1, 16, 64>}, {pipeline_mode = #tpu.pipeline_mode<synchronous>, transform_indices = @transform_1, window_bounds = array<i64: 1, 16>}, {pipeline_mode = #tpu.pipeline_mode<synchronous>, transform_indices = @transform_2, window_bounds = array<i64: 1, 1>}, {pipeline_mode = #tpu.pipeline_mode<synchronous>, transform_indices = @transform_3, window_bounds = array<i64: 1, 1>}, {transform_indices = @transform_4, window_bounds = array<i64: 1, 1, 64>}]} {
    %c0 = arith.constant 0 : index
    %c0_0 = arith.constant 0 : index
    %0 = vector.load %arg3[%c0, %c0_0] : memref<1x16xf32, #tpu.memory_space<vmem>>, vector<1x16xf32>
    %c0_1 = arith.constant 0 : index
    %c0_2 = arith.constant 0 : index
    %c0_3 = arith.constant 0 : index
    %1 = vector.load %arg2[%c0_1, %c0_2, %c0_3] : memref<1x16x64xf32, #tpu.memory_space<vmem>>, vector<1x16x64xf32>
    %2 = vector.shape_cast %1 : vector<1x16x64xf32> to vector<16x64xf32>
    %cst = arith.constant dense<0.000000e+00> : vector<1x64xf32>
    %3 = tpu.matmul %0, %2, %cst {dimension_numbers = #tpu.dot_dimension_numbers<[1], [0], [0], [1], [0, 0, 1, 1], [], []>} : vector<1x16xf32>, vector<16x64xf32>, vector<1x64xf32> -> vector<1x64xf32>
    %c0_4 = arith.constant 0 : index
    %c0_5 = arith.constant 0 : index
    %4 = vector.load %arg4[%c0_4, %c0_5] : memref<1x1xf32, #tpu.memory_space<vmem>>, vector<1x1xf32>
    %5 = vector.broadcast %4 : vector<1x1xf32> to vector<1x64xf32>
    %6 = arith.mulf %3, %5 : vector<1x64xf32>
    %c0_6 = arith.constant 0 : index
    %c0_7 = arith.constant 0 : index
    %7 = vector.load %arg5[%c0_6, %c0_7] : memref<1x1xf32, #tpu.memory_space<vmem>>, vector<1x1xf32>
    %8 = vector.broadcast %7 : vector<1x1xf32> to vector<1x64xf32>
    %9 = arith.addf %6, %8 : vector<1x64xf32>
    %cst_8 = arith.constant 0.000000e+00 : f32
    %10 = vector.broadcast %cst_8 : f32 to vector<1x64xf32>
    %11 = arith.maximumf %9, %10 : vector<1x64xf32>
    %c0_9 = arith.constant 0 : index
    %c0_10 = arith.constant 0 : index
    %c0_11 = arith.constant 0 : index
    %12 = vector.load %arg6[%c0_9, %c0_10, %c0_11] : memref<1x1x64xf32, #tpu.memory_space<vmem>>, vector<1x1x64xf32>
    %13 = vector.shape_cast %12 : vector<1x1x64xf32> to vector<1x64xf32>
    %14 = vector.shape_cast %11 : vector<1x64xf32> to vector<1x1x64xf32>
    tpu.vector_store %arg6[%c0_9, %c0_10, %c0_11], %14 {strides = array<i32>} : memref<1x1x64xf32, #tpu.memory_space<vmem>>, vector<1x1x64xf32>,
    return
  }
  func.func @transform_0(%arg0: i32, %arg1: i32) -> (i32, i32, i32) {
    %c0_i32 = arith.constant 0 : i32
    %c0_i32_0 = arith.constant 0 : i32
    return %arg0, %c0_i32, %arg1 : i32, i32, i32
  }
  func.func @transform_1(%arg0: i32, %arg1: i32) -> (i32, i32) {
    %c0_i32 = arith.constant 0 : i32
    %c0_i32_0 = arith.constant 0 : i32
    %c0_i32_1 = arith.constant 0 : i32
    return %c0_i32, %c0_i32_0 : i32, i32
  }
  func.func @transform_2(%arg0: i32, %arg1: i32) -> (i32, i32) {
    %c0_i32 = arith.constant 0 : i32
    %c0_i32_0 = arith.constant 0 : i32
    %c0_i32_1 = arith.constant 0 : i32
    return %c0_i32, %c0_i32_0 : i32, i32
  }
  func.func @transform_3(%arg0: i32, %arg1: i32) -> (i32, i32) {
    %c0_i32 = arith.constant 0 : i32
    %c0_i32_0 = arith.constant 0 : i32
    %c0_i32_1 = arith.constant 0 : i32
    return %c0_i32, %c0_i32_0 : i32, i32
  }
  func.func @transform_4(%arg0: i32, %arg1: i32) -> (i32, i32, i32) {
    %c0_i32 = arith.constant 0 : i32
    %c0_i32_0 = arith.constant 0 : i32
    return %arg0, %c0_i32, %arg1 : i32, i32, i32
  }
}

</mosaic_0001>

<bundles_post_ra>
// kernel: tpu_custom_call.1
= control target key start
LH: loop header
LB: loop body
LE: loop exit
PB: predicated region body
PF: predicated region fallthrough
CT: control target
= control target key end

     0   :  { %s726_s0 = inlined_call_operand.hbm [shape: f32[2,16,64], index: 0, kind: input, shape index: {}]   ;;  %s727_s1 = inlined_call_operand.vmem [shape: f32[1,16], index: 1, kind: input, shape index: {}]   ;;  %s728_s2 = inlined_call_operand.<no memory space> [shape: f32[1,1], index: 2, kind: input, shape index: {}]   ;;  %s729_s4 = inlined_call_operand.hbm [shape: f32[2,1,64], index: 4, kind: output, shape index: {}]   ;;  %s730_s3 = inlined_call_operand.<no memory space> [shape: f32[1,1], index: 3, kind: input, shape index: {}]  }
   0x1   :  { %v9_v0 = vstv %s728_s2  ;;  %v11_v1 = vstv %s730_s3 }
   0x2   :  { %10 = vst [vmem:[#allocation2] sm:$0x1] %v9_v0 }
   0x3   :  { %12 = vst [vmem:[#allocation3] sm:$0x1] %v11_v1 }
   0x4   :  { %13 = vsyncpa [#allocation5], 0 }
   0x5   :  { %15 = vsyncpa [#allocation5 + $0x1], 0 }
   0x6   :  { %16 = vsyncpa [#allocation6], 0 }
   0x7   :  { %18 = vsyncpa [#allocation6 + $0x1], 0  ;;  %s602_s19 = smov 0   ;;  %s604_s20 = smov 0  }
   0x8   :  { %s606_s21 = smov 0   ;;  %s608_s22 = smov 0  }
   0x9   :  { %s610_s23 = smov 0   ;;  %s612_s2 = smov 0  }
   0xa LB: > { %s375_s3 = sadd.s32 4294967295, %s566_s2   ;;  %s376_s24 = sadd.s32 4294967294, %s566_s2   ;;  %s566_s2 = sphi %s612_s2, %s24_s2   ;;  %s562_s23 = sphi %s610_s23, %s739_s23   ;;  %s558_s22 = sphi %s608_s22, %s738_s22   ;;  %s554_s21 = sphi %s606_s21, %s737_s21   ;;  %s550_s20 = sphi %s604_s20, %s736_s20   ;;  %s546_s19 = sphi %s602_s19, %s735_s19  }
   0xb   : > { %s36_s25 = sadd.s32 1, %s562_s23  ;;  %s45_s26 = sadd.s32 1, %s554_s21 }
   0xc   : > { %p38_p0 = scmp.ge.s32.totalorder %s36_s25, 2  ;;  %p52_p1 = scmp.ne.s32.totalorder %s554_s21, %s550_s20 }
   0xd   : > { %p53_p2 = scmp.eq.s32.totalorder %s566_s2, 0  ;;  %p58_p3 = scmp.ne.s32.totalorder %s550_s20, %s546_s19 }
   0xe   : > { %s741_s25 = smov (%p38_p0, %s36_s25), 0  ;;  %p59_p5 = scmp.eq.s32.totalorder %s375_s3, 0 }
   0xf   : > { %p643_p4 = por %p53_p2, %p52_p1  ;;  %s40_s28 = ssub.s32 %s562_s23, %s741_s25 }
  0x10   : > { %p147_p6 = scmp.eq.s32.totalorder %s375_s3, 1  ;;  %p43_p7 = scmp.eq.s32.totalorder %s40_s28, 0 }
  0x11   : > { %p649_p8 = por %p59_p5, %p58_p3  ;;  %p153_p10 = scmp.eq.s32.totalorder %s376_s24, 1 }
  0x12   : > { %p653_p9 = por %p147_p6, %p52_p1  ;;  %p378_p12 = scmp.ge.s32.totalorder %s566_s2, 2 }
  0x13   : > { %s658_s5 = scalar_select %p43_p7, %s554_s21, %s45_s26  }
  0x14   : > { %p660_p11 = por %p153_p10, %p58_p3  ;;  %p400_p13 = scmp.lt.s32.totalorder %s566_s2, 2 }
  0x15   : > { %s182_s7 = sand.u32 1, %s554_s21   ;;  %s387_s9 = sshll.u32 %s562_s23, 4 }
  0x16   : > { %s379_s8 = sshll.u32 %s182_s7, 4  ;;  %s192_s12 = scalar_lea.hbm %s726_s0, %s387_s9 }
  0x17   : > { %s186_s13 = scalar_lea.vmem [#allocation4], %s379_s8  ;;  %s193_s15 = sshll.u32 %s192_s12, 4  ;;  %s194_s15 = int_to_ptr.hbm [resolvable:$true] %s193_s15 }
  0x18   : > { %s195_s14 = sshll.u32 %s186_s13, 4  ;;  %p393_p0 = pnand %p400_p13, %p643_p4  ;;  %s196_s14 = int_to_ptr.vmem [resolvable:$true] %s195_s14 }
  0x19   : > { %p382_p1 = scmp.ge.s32.totalorder %s566_s2, 1  ;;  %s183_s16 = scalar_lea.sflag [#allocation5], %s182_s7 }
  0x1a   : > { %s568_s17 = smov 128   ;;  %s569_s18 = smov 8  }
  0x1b   : > { %395 = dma.hbm_to_vmem [thread:$0]  (!%p393_p0), %s194_s15, 256, %s196_s14, %s183_s16, %s568_s17, %s568_s17, %s569_s18  }
  0x1c   : > { %p203_p2 = scmp.lt.s32.totalorder %s566_s2, 3 }
  0x1e   : > { %p204_p3 = pnand %p382_p1, %p203_p2 }
  0x1f   : > { %s676_s3 = sand.u32 (!%p204_p3), 1, %s550_s20  }
  0x20   : > { %207 = sbr.rel (%p204_p3) target bundleno = 178 (0xb2), region = 36  ;;  %s383_s24 = sshll.u32 (!%p204_p3), %s676_s3, 4 }
  0x21   : > { %s210_s26 = scalar_lea.sflag (!%p204_p3), [#allocation5], %s676_s3  ;;  %s213_s28 = scalar_lea.vmem (!%p204_p3), [#allocation4], %s383_s24 }
  0x25   : > { %537 = dma.done.wait (%p649_p8), %s210_s26, 256  }
  0x26   : > { %539 = vsyncadd (%p649_p8), %s210_s26, 4294967040  ;;  %v570_v2 = vmov 0   ;;  %v265_v3 = vld [vmem:[#allocation2] sm:$0x1]  ;;  %v239_v5 = vld [vmem:[%s213_s28] sm:$0xff]  ;;  %vm241_vm0 = vcmask 130048   ;;  %s294_s9 = scalar_lea.hbm %s729_s4, %s558_s22 }
  0x27   : > { %453 = vset.pattern.permute.xlu0 %v570_v2  ;;  %v240_v4 = vld [vmem:[%s213_s28 + $0x8] sm:$0xff]  ;;  %s237_s10 = scalar_lea.vmem [#allocation7], %s676_s3  ;;  %s298_s12 = sshll.u32 %s294_s9, 4  ;;  %vm282_vm1 = vcmask 516096   ;;  %s299_s12 = int_to_ptr.hbm [resolvable:$true] %s298_s12 }
  0x28   : > { %268 = vperm.xlu0 %453, %v265_v3   ;;  %259 = vmatpush.msra.mxu0 %v240_v4  ;;  %v238_v6 = vld [vmem:[%s727_s1] sm:$0x1]  ;;  %v273_v7 = vld [vmem:[#allocation3] sm:$0x1]  ;;  %s296_s11 = sshll.u32 %s237_s10, 4  ;;  %s285_s13 = scalar_lea.sflag [#allocation6], %s676_s3  ;;  %s297_s11 = int_to_ptr.vmem [resolvable:$true] %s296_s11 }
  0x29   : > { %s498_s14 = sshra.s32 %s299_s12, 4  ;;  %s504_s17 = scalar_lea.hbm %s729_s4, 2  ;;  %s499_s14 = int_to_ptr.hbm [resolvable:$true] %s498_s14 }
  0x2a   : > { %260 = vmatpush.msra.mxu0 %v239_v5  ;;  %s500_s15 = scalar_lea.hbm %s499_s14, 1  ;;  %p505_p7 = scmp.lt.s32.totalorder %s499_s14, %s729_s4 }
  0x2b   : > { %384 = vmatmul.msk.f32.vlgmr.msra.gmra.mxu0 %vm241_vm0, %v238_v6  ;;  %p501_p4 = scmp.ne.s32.totalorder %s499_s14, %s500_s15  ;;  %p506_p8 = scmp.lt.s32.totalorder %s504_s17, %s500_s15 }
  0x2d   : > { %p502_p5 = pnand %p501_p4, %p653_p9  ;;  %p507_p10 = por %p506_p8, %p505_p7 }
  0x2f   : > { %p503_p6 = pneg %p502_p5 }
  0x30   : > { %276 = vperm.xlu0 %453, %v273_v7  }
  0x31   : > { %p508_p13 = pnand %p507_p10, %p503_p6 }
  0x9a   : > { %v269_v8 = vpop.permute.xlu0 %268 }
  0x9b   : > { %v271_v10 = vperm.slane %v269_v8, 0 }
  0xa2   : > { %v277_v9 = vpop.permute.xlu0 %276 }
  0xa3   : > { %v279_v12 = vperm.slane %v277_v9, 0 }
  0xa8   : > { %v262_v11 = vpop.f32.mrf.mxu0 }
  0xa9   : > { %v272_v13 = vmul.f32 %v271_v10, %v262_v11 }
  0xab   : > { %v280_v14 = vadd.f32 %v279_v12, %v272_v13 }
  0xad   : > { %v281_v15 = vmax.f32 %v280_v14, 0.0 }
  0xaf   : > { %283 = vst.msk [vmem:[%s237_s10] sm:$0x1] %vm282_vm1, %v281_v15 }
  0xb0   : > { %511 = shalt.err (!%p508_p13)
}
  0xb1   : > { %390 = dma.vmem_to_hbm [thread:$0]  (%p653_p9), %s297_s11, 16, %s299_s12, %s285_s13  }
  0xb2 PF: > { %s310_s3 = sand.u32 1, %s546_s19   ;;  %p397_p0 = pnand %p378_p12, %p660_p11 }
  0xb3   : > { %s311_s26 = scalar_lea.sflag [#allocation6], %s310_s3 }
  0xb4   : > { %p398_p1 = pneg %p397_p0 }
  0xb6   : > { %541 = dma.done.wait (%p398_p1), %s311_s26, 16  }
  0xb7   : > { %543 = vsyncadd (%p398_p1), %s311_s26, 4294967280  ;;  %s24_s2 = sadd.s32 1, %s566_s2   ;;  %s735_s19 = smov %s550_s20 }
  0xb8   : > { %p21_p2 = scmp.ge.s32.totalorder %s24_s2, 4   ;;  %s736_s20 = smov %s554_s21 }
  0xb9   : > { %s737_s21 = smov %s658_s5  ;;  %s738_s22 = smov %s562_s23 }
  0xba   : > { %s739_s23 = smov %s741_s25  ;;  %23 = sbr.rel (!%p21_p2) target bundleno = 10 (0xa), region = 81 }
  0xbf   :  { %316 = vsyncpa [#allocation5], 1 }
  0xc0   :  { %318 = vsyncpa [#allocation5 + $0x1], 1 }
  0xc1   :  { %319 = vsyncpa [#allocation6], 1 }
  0xc2   :  { %321 = vsyncpa [#allocation6 + $0x1], 1 }

</bundles_post_ra>
